<compile_context>
chip_gen: v6e
topology: v6e:2x2x1
jax: 0.10.0
libtpu: 0.0.40
codegen_flags: <defaults>
</compile_context>

<pallas_src>
import functools

import numpy as np
import jax
import jax.numpy as jnp
from jax.experimental import pallas as pl
from jax.experimental.pallas import tpu as pltpu

# ------------------------- model hyper-parameters ---------------------------
NUM_HEADS = 4
HEAD_SIZE = 8
N_EMBED = NUM_HEADS * HEAD_SIZE   # 32
HIDDEN = 4 * N_EMBED              # 128 (FeedForward inner width = slab lane width)
BLOCK_SIZE = 8                    # max sequence length (tril buffer size)
BATCH = 2
SEQ = 8                           # T (<= BLOCK_SIZE)
LN_EPS = 1e-5                     # PyTorch nn.LayerNorm default


# ----------------------- host-side parameter packing ------------------------
def pack_block_params(wq, wk, wv, wpT, bp, w1T, b1, w2T, b2,
                      ln1g, ln1b, ln2g, ln2b, *, batch, seq):
    """Pack every Block parameter + the attention mask into one (120, 128) slab.

    Row layout (C = n_embed = 32, W = 4C = 128 lanes):
      rows [0,   C)   cols [0,3C) : fused [Wq|Wk|Wv]   cols [3C,4C) : Wproj
      rows [C,  2C)               : W1 (FFN in,  C x 4C)
      rows [2C, 3C)               : W2 (FFN out, stored transposed, C x 4C)
      row   3C                    : b1 (4C)
      rows  3C+1 .. 3C+6, cols<C  : ln1g, ln1b, bproj, ln2g, ln2b, b2
      row   3C+7                  : zero padding
      rows [3C+8, 3C+8+BT), <BT   : additive causal/batch-block mask (0 / -1e30)
    """
    C = wq.shape[0]
    W = 4 * C
    bt = batch * seq
    assert bt <= W and w1T.shape[1] == W and w2T.shape == (W, C)

    def pad_row(v):  # (1, n) -> (1, W)
        return jnp.pad(v.astype(jnp.float32), ((0, 0), (0, W - v.shape[1])))

    top = jnp.concatenate([wq, wk, wv, wpT], axis=1)            # (C, 4C)
    w2 = w2T.T                                                  # (C, 4C)
    prow = jnp.concatenate(
        [pad_row(b1),
         pad_row(ln1g), pad_row(ln1b), pad_row(bp),
         pad_row(ln2g), pad_row(ln2b), pad_row(b2),
         jnp.zeros((1, W), jnp.float32)], axis=0)               # (8, 4C)

    # Trace-time constant mask (hoisted out of the kernel): attend only within
    # the same batch element and to non-future positions.
    rows = np.arange(bt)[:, None]
    cols = np.arange(bt)[None, :]
    valid = (rows >= cols) & ((rows // seq) == (cols // seq))
    bias = np.where(valid, np.float32(0.0), np.float32(-1e30)).astype(np.float32)
    bias = jnp.pad(jnp.asarray(bias), ((0, 0), (0, W - bt)))    # (BT, 4C)

    slab = jnp.concatenate(
        [top.astype(jnp.float32), w1T.astype(jnp.float32), w2.astype(jnp.float32),
         prow, bias], axis=0)                                   # (3C+8+BT, 4C)
    return slab


# ------------------------------- Pallas kernel ------------------------------
def block_kernel(x_ref, w_ref, o_ref, *, num_heads, head_size):
    """Whole Block forward on the flattened batch.

    x_ref : (B*T, C)        VMEM activations
    w_ref : (3C+8+B*T, 4C)  packed parameter + mask slab (see pack_block_params)
    o_ref : (B*T, C)
    """
    bt, c = x_ref.shape
    x = x_ref[...].astype(jnp.float32)

    # ---- static views into the packed slab (address math only, no DMAs) ----
    w_qkv = w_ref[0:c, 0:3 * c]                      # (C, 3C) fused [Wq|Wk|Wv]
    w_p = w_ref[0:c, 3 * c:4 * c]                    # (C, C)  attention out-proj
    w_1 = w_ref[c:2 * c, :]                          # (C, 4C) FFN first linear
    w_2 = w_ref[2 * c:3 * c, :]                      # (C, 4C) FFN second (pre-transposed)
    pbase = 3 * c
    b1 = w_ref[pbase:pbase + 1, :]                   # (1, 4C)
    ln1g = w_ref[pbase + 1:pbase + 2, 0:c]           # (1, C)
    ln1b = w_ref[pbase + 2:pbase + 3, 0:c]
    bp = w_ref[pbase + 3:pbase + 4, 0:c]
    ln2g = w_ref[pbase + 4:pbase + 5, 0:c]
    ln2b = w_ref[pbase + 5:pbase + 6, 0:c]
    b2 = w_ref[pbase + 6:pbase + 7, 0:c]
    bias = w_ref[pbase + 8:pbase + 8 + bt, 0:bt]     # (BT, BT) additive mask

    def layer_norm(z, g, b):
        mu = jnp.mean(z, axis=-1, keepdims=True)
        d = z - mu
        var = jnp.mean(d * d, axis=-1, keepdims=True)
        return d * jax.lax.rsqrt(var + LN_EPS) * g + b

    # ---------------- self-attention branch: sa(ln1(x)) ----------------
    h1 = layer_norm(x, ln1g, ln1b)
    qkv = jnp.dot(h1, w_qkv, preferred_element_type=jnp.float32)   # (BT, 3C)

    def to_heads(z):  # (BT, C) -> (H, BT, hs); leading batch dim for Mosaic dot
        return jnp.transpose(z.reshape(bt, num_heads, head_size), (1, 0, 2))

    q = to_heads(qkv[:, :c])
    k = to_heads(qkv[:, c:2 * c])
    v = to_heads(qkv[:, 2 * c:3 * c])

    # NOTE: PyTorch Head scales by n_embed**-0.5 (not head_size**-0.5); keep it.
    scale = c ** (-0.5)

    s = jnp.einsum('hqd,hkd->hqk', q, k,
                   preferred_element_type=jnp.float32) * scale     # (H, BT, BT)
    s = s + bias[None, :, :]          # hoisted causal/batch-block mask (finite fill)

    # Numerically-stable softmax; denominator reciprocal on the (idle) EUP slot.
    s = s - jnp.max(s, axis=-1, keepdims=True)
    p = jnp.exp(s)
    p = p * pl.reciprocal(jnp.sum(p, axis=-1, keepdims=True), approx=True)

    # TODO(synk): dropout on attention probs / proj output / ffwd output omitted
    # (eval/inference mode — identity).
    attn = jnp.einsum('hqk,hkd->hqd', p, v,
                      preferred_element_type=jnp.float32)          # (H, BT, hs)
    attn = jnp.transpose(attn, (1, 0, 2)).reshape(bt, c)           # concat heads

    sa = jnp.dot(attn, w_p, preferred_element_type=jnp.float32) + bp
    x1 = x + sa                                                    # residual 1

    # ---------------- feed-forward branch: ffwd(ln2(x1)) ----------------
    h2 = layer_norm(x1, ln2g, ln2b)
    f = jnp.dot(h2, w_1, preferred_element_type=jnp.float32) + b1
    f = jnp.maximum(f, 0.0)                                        # ReLU
    # w_2 stored as (C, 4C): contract last dims ("NT" matmul, no materialized .T)
    f = jax.lax.dot_general(f, w_2, (((1,), (1,)), ((), ())),
                            preferred_element_type=jnp.float32) + b2

    o_ref[...] = (x1 + f).astype(o_ref.dtype)                      # residual 2


# --------------------------------- wrapper ----------------------------------
@jax.jit
def transformer_block(x, slab):
    B, T, C = x.shape
    kernel = functools.partial(block_kernel,
                               num_heads=NUM_HEADS, head_size=HEAD_SIZE)
    vmem = lambda: pl.BlockSpec(memory_space=pltpu.MemorySpace.VMEM)
    out = pl.pallas_call(
        kernel,
        out_shape=jax.ShapeDtypeStruct((B * T, C), x.dtype),
        in_specs=[vmem(), vmem()],      # exactly 2 input DMAs: activations + slab
        out_specs=vmem(),
    )(x.reshape(B * T, C), slab)
    return out.reshape(B, T, C)


# ------------------------- pure-JAX reference check -------------------------
def reference(x, ln1g, ln1b, wq, wk, wv, wpT, bp, ln2g, ln2b, w1T, b1, w2T, b2):
    def ln(z, g, b):
        mu = z.mean(-1, keepdims=True)
        var = ((z - mu) ** 2).mean(-1, keepdims=True)
        return (z - mu) / jnp.sqrt(var + LN_EPS) * g + b

    B, T, C = x.shape
    h = ln(x, ln1g[0], ln1b[0])
    q, k, v = h @ wq, h @ wk, h @ wv
    mask = jnp.tril(jnp.ones((T, T), dtype=bool))
    outs = []
    for hd in range(NUM_HEADS):
        s0, e0 = hd * HEAD_SIZE, (hd + 1) * HEAD_SIZE
        wei = (q[..., s0:e0] @ jnp.swapaxes(k[..., s0:e0], -1, -2)) * (C ** -0.5)
        wei = jnp.where(mask, wei, -jnp.inf)
        wei = jax.nn.softmax(wei, axis=-1)
        outs.append(wei @ v[..., s0:e0])
    sa = jnp.concatenate(outs, axis=-1) @ wpT + bp[0]
    x1 = x + sa
    h2 = ln(x1, ln2g[0], ln2b[0])
    f = jnp.maximum(h2 @ w1T + b1[0], 0.0)
    f = f @ w2T + b2[0]
    return x1 + f


if __name__ == "__main__":
    key = jax.random.PRNGKey(0)
    keys = jax.random.split(key, 14)

    def uni(k, shape, limv):
        return jax.random.uniform(k, shape, minval=-limv, maxval=limv,
                                  dtype=jnp.float32)

    # PyTorch nn.Linear default init: U(-1/sqrt(fan_in), 1/sqrt(fan_in))
    lim = 1.0 / (N_EMBED ** 0.5)
    lim_ff = 1.0 / (HIDDEN ** 0.5)

    x = jax.random.normal(keys[0], (BATCH, SEQ, N_EMBED), dtype=jnp.float32)

    wq = uni(keys[1], (N_EMBED, N_EMBED), lim)           # heads packed along columns
    wk = uni(keys[2], (N_EMBED, N_EMBED), lim)
    wv = uni(keys[3], (N_EMBED, N_EMBED), lim)
    wpT = uni(keys[4], (N_EMBED, N_EMBED), lim)
    bp = uni(keys[5], (1, N_EMBED), lim)
    w1T = uni(keys[6], (N_EMBED, HIDDEN), lim)
    b1 = uni(keys[7], (1, HIDDEN), lim)
    w2T = uni(keys[8], (HIDDEN, N_EMBED), lim_ff)
    b2 = uni(keys[9], (1, N_EMBED), lim_ff)
    ln1g = 1.0 + 0.1 * jax.random.normal(keys[10], (1, N_EMBED), dtype=jnp.float32)
    ln1b = 0.1 * jax.random.normal(keys[11], (1, N_EMBED), dtype=jnp.float32)
    ln2g = 1.0 + 0.1 * jax.random.normal(keys[12], (1, N_EMBED), dtype=jnp.float32)
    ln2b = 0.1 * jax.random.normal(keys[13], (1, N_EMBED), dtype=jnp.float32)

    # Pack weights + biases + layernorm params + attention mask ONCE (one DMA).
    slab = pack_block_params(wq, wk, wv, wpT, bp, w1T, b1, w2T, b2,
                             ln1g, ln1b, ln2g, ln2b, batch=BATCH, seq=SEQ)
    slab = jax.block_until_ready(slab)

    out = transformer_block(x, slab)
    out = jax.block_until_ready(out)

    ref = reference(x, ln1g, ln1b, wq, wk, wv, wpT, bp,
                    ln2g, ln2b, w1T, b1, w2T, b2)
    assert out.shape == (BATCH, SEQ, N_EMBED)
    # tolerance loosened slightly for the EUP approximate reciprocal in softmax
    assert jnp.allclose(out, ref, atol=2e-3, rtol=2e-3), (
        f"mismatch vs reference: max abs err {jnp.max(jnp.abs(out - ref))}")

    print("KERNEL_OK")
</pallas_src>

<mosaic_0001>
module attributes {stable_mosaic.version = 11 : i64} {
  func.func @block_kernel(%arg0: memref<16x32xf32, #tpu.memory_space<vmem>>, %arg1: memref<120x128xf32, #tpu.memory_space<vmem>>, %arg2: memref<16x32xf32, #tpu.memory_space<vmem>>) attributes {dimension_semantics = [], scalar_prefetch = 0 : i64, scratch_operands = 0 : i64, tpu.core_type = #tpu.core_type<tc>} {
    %c0 = arith.constant 0 : index
    %c0_0 = arith.constant 0 : index
    %0 = vector.load %arg0[%c0, %c0_0] : memref<16x32xf32, #tpu.memory_space<vmem>>, vector<16x32xf32>
    %c0_1 = arith.constant 0 : index
    %c0_2 = arith.constant 0 : index
    %1 = vector.load %arg1[%c0_1, %c0_2] : memref<120x128xf32, #tpu.memory_space<vmem>>, vector<32x96xf32>
    %c0_3 = arith.constant 0 : index
    %c96 = arith.constant 96 : index
    %2 = vector.load %arg1[%c0_3, %c96] : memref<120x128xf32, #tpu.memory_space<vmem>>, vector<32x32xf32>
    %c32 = arith.constant 32 : index
    %c0_4 = arith.constant 0 : index
    %3 = vector.load %arg1[%c32, %c0_4] : memref<120x128xf32, #tpu.memory_space<vmem>>, vector<32x128xf32>
    %c64 = arith.constant 64 : index
    %c0_5 = arith.constant 0 : index
    %4 = vector.load %arg1[%c64, %c0_5] : memref<120x128xf32, #tpu.memory_space<vmem>>, vector<32x128xf32>
    %c96_6 = arith.constant 96 : index
    %c0_7 = arith.constant 0 : index
    %5 = vector.load %arg1[%c96_6, %c0_7] : memref<120x128xf32, #tpu.memory_space<vmem>>, vector<1x128xf32>
    %c97 = arith.constant 97 : index
    %c0_8 = arith.constant 0 : index
    %6 = vector.load %arg1[%c97, %c0_8] : memref<120x128xf32, #tpu.memory_space<vmem>>, vector<1x32xf32>
    %c98 = arith.constant 98 : index
    %c0_9 = arith.constant 0 : index
    %7 = vector.load %arg1[%c98, %c0_9] : memref<120x128xf32, #tpu.memory_space<vmem>>, vector<1x32xf32>
    %c99 = arith.constant 99 : index
    %c0_10 = arith.constant 0 : index
    %8 = vector.load %arg1[%c99, %c0_10] : memref<120x128xf32, #tpu.memory_space<vmem>>, vector<1x32xf32>
    %c100 = arith.constant 100 : index
    %c0_11 = arith.constant 0 : index
    %9 = vector.load %arg1[%c100, %c0_11] : memref<120x128xf32, #tpu.memory_space<vmem>>, vector<1x32xf32>
    %c101 = arith.constant 101 : index
    %c0_12 = arith.constant 0 : index
    %10 = vector.load %arg1[%c101, %c0_12] : memref<120x128xf32, #tpu.memory_space<vmem>>, vector<1x32xf32>
    %c102 = arith.constant 102 : index
    %c0_13 = arith.constant 0 : index
    %11 = vector.load %arg1[%c102, %c0_13] : memref<120x128xf32, #tpu.memory_space<vmem>>, vector<1x32xf32>
    %c104 = arith.constant 104 : index
    %c0_14 = arith.constant 0 : index
    %12 = vector.load %arg1[%c104, %c0_14] : memref<120x128xf32, #tpu.memory_space<vmem>>, vector<16x16xf32>
    %cst = arith.constant dense<0.000000e+00> : vector<16xf32>
    %13 = vector.multi_reduction <add>, %0, %cst [1] : vector<16x32xf32> to vector<16xf32>
    %14 = vector.shape_cast %13 : vector<16xf32> to vector<16x1xf32>
    %cst_15 = arith.constant 3.200000e+01 : f32
    %15 = vector.broadcast %cst_15 : f32 to vector<16x1xf32>
    %16 = arith.divf %14, %15 : vector<16x1xf32>
    %17 = vector.broadcast %16 : vector<16x1xf32> to vector<16x32xf32>
    %18 = arith.subf %0, %17 : vector<16x32xf32>
    %19 = arith.mulf %18, %18 : vector<16x32xf32>
    %cst_16 = arith.constant dense<0.000000e+00> : vector<16xf32>
    %20 = vector.multi_reduction <add>, %19, %cst_16 [1] : vector<16x32xf32> to vector<16xf32>
    %21 = vector.shape_cast %20 : vector<16xf32> to vector<16x1xf32>
    %cst_17 = arith.constant 3.200000e+01 : f32
    %22 = vector.broadcast %cst_17 : f32 to vector<16x1xf32>
    %23 = arith.divf %21, %22 : vector<16x1xf32>
    %cst_18 = arith.constant 9.99999974E-6 : f32
    %24 = vector.broadcast %cst_18 : f32 to vector<16x1xf32>
    %25 = arith.addf %23, %24 : vector<16x1xf32>
    %26 = math.rsqrt %25 : vector<16x1xf32>
    %27 = vector.broadcast %26 : vector<16x1xf32> to vector<16x32xf32>
    %28 = arith.mulf %18, %27 : vector<16x32xf32>
    %29 = vector.broadcast %6 : vector<1x32xf32> to vector<16x32xf32>
    %30 = arith.mulf %28, %29 : vector<16x32xf32>
    %31 = vector.broadcast %7 : vector<1x32xf32> to vector<16x32xf32>
    %32 = arith.addf %30, %31 : vector<16x32xf32>
    %cst_19 = arith.constant dense<0.000000e+00> : vector<16x96xf32>
    %33 = tpu.matmul %32, %1, %cst_19 {dimension_numbers = #tpu.dot_dimension_numbers<[1], [0], [0], [1], [0, 0, 1, 1], [], []>} : vector<16x32xf32>, vector<32x96xf32>, vector<16x96xf32> -> vector<16x96xf32>
    %34 = vector.extract_strided_slice %33 {offsets = [0, 0], sizes = [16, 32], strides = [1, 1]} : vector<16x96xf32> to vector<16x32xf32>
    %35 = vector.shape_cast %34 : vector<16x32xf32> to vector<16x4x8xf32>
    %36 = tpu.transpose %35, [1, 0, 2] : vector<16x4x8xf32> -> vector<4x16x8xf32>
    %37 = vector.extract_strided_slice %33 {offsets = [0, 32], sizes = [16, 32], strides = [1, 1]} : vector<16x96xf32> to vector<16x32xf32>
    %38 = vector.shape_cast %37 : vector<16x32xf32> to vector<16x4x8xf32>
    %39 = tpu.transpose %38, [1, 0, 2] : vector<16x4x8xf32> -> vector<4x16x8xf32>
    %40 = vector.extract_strided_slice %33 {offsets = [0, 64], sizes = [16, 32], strides = [1, 1]} : vector<16x96xf32> to vector<16x32xf32>
    %41 = vector.shape_cast %40 : vector<16x32xf32> to vector<16x4x8xf32>
    %42 = tpu.transpose %41, [1, 0, 2] : vector<16x4x8xf32> -> vector<4x16x8xf32>
    "tpu.trace_start"() <{level = 10 : i32, message = "hqd,hkd->hqk"}> : () -> ()
    %cst_20 = arith.constant dense<0.000000e+00> : vector<4x16x16xf32>
    %43 = tpu.matmul %36, %39, %cst_20 {dimension_numbers = #tpu.dot_dimension_numbers<[2], [2], [1], [1], [0, 0, 0, 1, 1, 1], [0], [0]>} : vector<4x16x8xf32>, vector<4x16x8xf32>, vector<4x16x16xf32> -> vector<4x16x16xf32>
    "tpu.trace_stop"() : () -> ()
    %cst_21 = arith.constant 0.176776692 : f32
    %44 = vector.broadcast %cst_21 : f32 to vector<4x16x16xf32>
    %45 = arith.mulf %43, %44 : vector<4x16x16xf32>
    %46 = vector.shape_cast %12 : vector<16x16xf32> to vector<1x16x16xf32>
    %47 = vector.broadcast %46 : vector<1x16x16xf32> to vector<4x16x16xf32>
    %48 = arith.addf %45, %47 : vector<4x16x16xf32>
    %cst_22 = arith.constant dense<0xFF800000> : vector<4x16xf32>
    %49 = vector.multi_reduction <maximumf>, %48, %cst_22 [2] : vector<4x16x16xf32> to vector<4x16xf32>
    %50 = vector.shape_cast %49 : vector<4x16xf32> to vector<4x16x1xf32>
    %51 = vector.broadcast %50 : vector<4x16x1xf32> to vector<4x16x16xf32>
    %52 = arith.subf %48, %51 : vector<4x16x16xf32>
    %53 = math.exp %52 : vector<4x16x16xf32>
    %cst_23 = arith.constant dense<0.000000e+00> : vector<4x16xf32>
    %54 = vector.multi_reduction <add>, %53, %cst_23 [2] : vector<4x16x16xf32> to vector<4x16xf32>
    %55 = vector.shape_cast %54 : vector<4x16xf32> to vector<4x16x1xf32>
    %56 = tpu.reciprocal %55 {approx = true} : vector<4x16x1xf32> -> vector<4x16x1xf32>
    %57 = vector.broadcast %56 : vector<4x16x1xf32> to vector<4x16x16xf32>
    %58 = arith.mulf %53, %57 : vector<4x16x16xf32>
    "tpu.trace_start"() <{level = 10 : i32, message = "hqk,hkd->hqd"}> : () -> ()
    %cst_24 = arith.constant dense<0.000000e+00> : vector<4x16x8xf32>
    %59 = tpu.matmul %58, %42, %cst_24 {dimension_numbers = #tpu.dot_dimension_numbers<[2], [1], [1], [2], [0, 0, 0, 1, 1, 2], [0], [0]>} : vector<4x16x16xf32>, vector<4x16x8xf32>, vector<4x16x8xf32> -> vector<4x16x8xf32>
    "tpu.trace_stop"() : () -> ()
    %60 = tpu.transpose %59, [1, 0, 2] : vector<4x16x8xf32> -> vector<16x4x8xf32>
    %61 = vector.shape_cast %60 : vector<16x4x8xf32> to vector<16x32xf32>
    %cst_25 = arith.constant dense<0.000000e+00> : vector<16x32xf32>
    %62 = tpu.matmul %61, %2, %cst_25 {dimension_numbers = #tpu.dot_dimension_numbers<[1], [0], [0], [1], [0, 0, 1, 1], [], []>} : vector<16x32xf32>, vector<32x32xf32>, vector<16x32xf32> -> vector<16x32xf32>
    %63 = vector.broadcast %8 : vector<1x32xf32> to vector<16x32xf32>
    %64 = arith.addf %62, %63 : vector<16x32xf32>
    %65 = arith.addf %0, %64 : vector<16x32xf32>
    %cst_26 = arith.constant dense<0.000000e+00> : vector<16xf32>
    %66 = vector.multi_reduction <add>, %65, %cst_26 [1] : vector<16x32xf32> to vector<16xf32>
    %67 = vector.shape_cast %66 : vector<16xf32> to vector<16x1xf32>
    %cst_27 = arith.constant 3.200000e+01 : f32
    %68 = vector.broadcast %cst_27 : f32 to vector<16x1xf32>
    %69 = arith.divf %67, %68 : vector<16x1xf32>
    %70 = vector.broadcast %69 : vector<16x1xf32> to vector<16x32xf32>
    %71 = arith.subf %65, %70 : vector<16x32xf32>
    %72 = arith.mulf %71, %71 : vector<16x32xf32>
    %cst_28 = arith.constant dense<0.000000e+00> : vector<16xf32>
    %73 = vector.multi_reduction <add>, %72, %cst_28 [1] : vector<16x32xf32> to vector<16xf32>
    %74 = vector.shape_cast %73 : vector<16xf32> to vector<16x1xf32>
    %cst_29 = arith.constant 3.200000e+01 : f32
    %75 = vector.broadcast %cst_29 : f32 to vector<16x1xf32>
    %76 = arith.divf %74, %75 : vector<16x1xf32>
    %cst_30 = arith.constant 9.99999974E-6 : f32
    %77 = vector.broadcast %cst_30 : f32 to vector<16x1xf32>
    %78 = arith.addf %76, %77 : vector<16x1xf32>
    %79 = math.rsqrt %78 : vector<16x1xf32>
    %80 = vector.broadcast %79 : vector<16x1xf32> to vector<16x32xf32>
    %81 = arith.mulf %71, %80 : vector<16x32xf32>
    %82 = vector.broadcast %9 : vector<1x32xf32> to vector<16x32xf32>
    %83 = arith.mulf %81, %82 : vector<16x32xf32>
    %84 = vector.broadcast %10 : vector<1x32xf32> to vector<16x32xf32>
    %85 = arith.addf %83, %84 : vector<16x32xf32>
    %cst_31 = arith.constant dense<0.000000e+00> : vector<16x128xf32>
    %86 = tpu.matmul %85, %3, %cst_31 {dimension_numbers = #tpu.dot_dimension_numbers<[1], [0], [0], [1], [0, 0, 1, 1], [], []>} : vector<16x32xf32>, vector<32x128xf32>, vector<16x128xf32> -> vector<16x128xf32>
    %87 = vector.broadcast %5 : vector<1x128xf32> to vector<16x128xf32>
    %88 = arith.addf %86, %87 : vector<16x128xf32>
    %cst_32 = arith.constant 0.000000e+00 : f32
    %89 = vector.broadcast %cst_32 : f32 to vector<16x128xf32>
    %90 = arith.maximumf %88, %89 : vector<16x128xf32>
    %cst_33 = arith.constant dense<0.000000e+00> : vector<16x32xf32>
    %91 = tpu.matmul %90, %4, %cst_33 {dimension_numbers = #tpu.dot_dimension_numbers<[1], [1], [0], [0], [0, 0, 1, 0], [], []>} : vector<16x128xf32>, vector<32x128xf32>, vector<16x32xf32> -> vector<16x32xf32>
    %92 = vector.broadcast %11 : vector<1x32xf32> to vector<16x32xf32>
    %93 = arith.addf %91, %92 : vector<16x32xf32>
    %94 = arith.addf %65, %93 : vector<16x32xf32>
    %c0_34 = arith.constant 0 : index
    %c0_35 = arith.constant 0 : index
    %95 = vector.load %arg2[%c0_34, %c0_35] : memref<16x32xf32, #tpu.memory_space<vmem>>, vector<16x32xf32>
    tpu.vector_store %arg2[%c0_34, %c0_35], %94 {strides = array<i32>} : memref<16x32xf32, #tpu.memory_space<vmem>>, vector<16x32xf32>,
    return
  }
}

</mosaic_0001>

<bundles_post_ra>
// kernel: transformer_block.1
= control target key start
LH: loop header
LB: loop body
LE: loop exit
PB: predicated region body
PF: predicated region fallthrough
CT: control target
= control target key end

     0   :  { %7 = vsyncpa [#allocation3], 0  ;;  %s3198_s0 = inlined_call_operand.hbm [shape: f32[16,32], index: 0, kind: input, shape index: {}]   ;;  %s3199_s1 = inlined_call_operand.hbm [shape: f32[120,128], index: 1, kind: input, shape index: {}]   ;;  %s3200_s2 = inlined_call_operand.hbm [shape: f32[16,32], index: 2, kind: output, shape index: {}]  }
   0x1   :  { %8 = vsyncpa [#allocation6], 0 }
   0x2   :  { %9 = vsyncpa [#allocation4], 0  ;;  %s2811_s9 = smov [#allocation2]  }
   0x3   :  { %s15_s10 = sshll.u32 %s2811_s9, 4  ;;  %s16_s10 = int_to_ptr.vmem [resolvable:$true] %s15_s10 }
   0x4   :  { %s2753_s11 = scalar_lea.vmem %s16_s10, 256  ;;  %p2758_p1 = scmp.lt.s32.totalorder %s16_s10, %s16_s10 }
   0x5   :  { %p2754_p0 = scmp.ne.s32.totalorder %s16_s10, %s2753_s11  ;;  %p2759_p2 = scmp.lt.s32.totalorder %s2753_s11, %s2753_s11 }
   0x7   :  { %p2760_p3 = por %p2759_p2, %p2758_p1 }
   0x9   :  { %p2761_p4 = pnand %p2760_p3, %p2754_p0 }
   0xb   :  { %2764 = shalt.err (!%p2761_p4)
}
   0xc   :  { %s2812_s12 = smov 128   ;;  %s2813_s13 = smov 8  }
   0xd   :  { %21 = dma.hbm_to_vmem [thread:$0]  %s3198_s0, 256, %s16_s10, [#allocation3], %s2812_s12, %s2812_s12, %s2813_s13  }
   0xe   :  { %s2814_s16 = smov [#allocation5]  }
   0xf   :  { %s27_s17 = sshll.u32 %s2814_s16, 4  ;;  %s28_s17 = int_to_ptr.vmem [resolvable:$true] %s27_s17 }
  0x10   :  { %s2773_s18 = scalar_lea.vmem %s28_s17, 1920  ;;  %p2778_p6 = scmp.lt.s32.totalorder %s28_s17, %s28_s17 }
  0x11   :  { %p2774_p5 = scmp.ne.s32.totalorder %s28_s17, %s2773_s18  ;;  %p2779_p7 = scmp.lt.s32.totalorder %s2773_s18, %s2773_s18 }
  0x13   :  { %p2780_p8 = por %p2779_p7, %p2778_p6 }
  0x15   :  { %p2781_p9 = pnand %p2780_p8, %p2774_p5 }
  0x17   :  { %2784 = shalt.err (!%p2781_p9)
}
  0x18   :  { %33 = dma.hbm_to_vmem [thread:$0]  %s3199_s1, 1920, %s28_s17, [#allocation6], %s2812_s12, %s2812_s12, %s2813_s13  }
  0x19   :  { %2805 = dma.done.wait [#allocation3], 256  }
  0x1a   :  { %2806 = vsyncadd [#allocation3], 4294967040 }
  0x1b   :  { %2807 = dma.done.wait [#allocation6], 1920  }
  0x1c   :  { %2808 = vsyncadd [#allocation6], 4294965376  ;;  %vm63_vm0 = vcmask 261120   ;;  %v40_v0 = vld [vmem:[#allocation2] sm:$0xff]  ;;  %v41_v1 = vld [vmem:[#allocation2 + $0x8] sm:$0xff]  ;;  %s2815_s0 = smov 112   ;;  %v209_v42 = vlaneseq }
  0x1d   :  { %v64_v2 = vsel %vm63_vm0, %v40_v0, 0.0  ;;  %v67_v3 = vsel %vm63_vm0, %v41_v1, 0.0  ;;  %v2857_v14 = vld [vmem:[#allocation5 + $0x18] sm:$0xff]  ;;  %v2859_v15 = vld [vmem:[#allocation5 + $0x10] sm:$0xff]  ;;  %v2863_v16 = vld [vmem:[#allocation5 + $0x8] sm:$0xff]  ;;  %s2816_s1 = smov 120  }
  0x1e   :  { %65 = vadd.xlane.f32.xlu0 %v64_v2  ;;  %2587 = vmatprep.subr.mxu1 %v2857_v14  ;;  %v42_v17 = vld [vmem:[#allocation5] sm:$0xff]  ;;  %s2817_s21 = smov 104   ;;  %s2818_s22 = smov 96   ;;  %v2819_v40 = vmov 1983009808   ;;  %v210_v47 = vshrl.u32 %v209_v42, 7 }
  0x1f   :  { %2588 = vmatpush3.msra.mxu1 %v2857_v14  ;;  %v2478_v25 = vld [vmem:[#allocation5 + $0x61] ss:$0 sm:$0xff]  ;;  %v2479_v27 = vld [vmem:[#allocation5 + $0x62] ss:$0 sm:$0xff]  ;;  %v207_v41 = vunpack.c.l.s4 %v2819_v40  ;;  %v2820_v44 = vmov 1934713408  }
  0x20   :  { %2589 = vmatprep.subr.mxu1 %v2859_v15  ;;  %v239_v45 = vunpack.c.l.s4 %v2820_v44  ;;  %vm1068_vm1 = vcmask 64512   ;;  %vm1433_vm2 = vcmask 130048   ;;  %s2821_s23 = smov 64   ;;  %s2822_s24 = smov 32   ;;  %vm2146_vm3 = vcmask 195584  }
  0x21   :  { %2590 = vmatpush3.msra.mxu1 %v2859_v15  ;;  %v208_v46 = vunpack.c.0.s8 %v207_v41  ;;  %s2823_s25 = smov 16   ;;  %s2824_s26 = smov 24  }
  0x22   :  { %68 = vadd.xlane.f32.xlu0 %v67_v3  ;;  %2591 = vmatprep.subr.mxu1 %v2863_v16  ;;  %v240_v51 = vunpack.c.0.s8 %v239_v45  ;;  %s2825_s27 = smov [#allocation7]  }
  0x23   :  { %2592 = vmatpush3.msra.mxu1 %v2863_v16  ;;  %v2904_v52 = vsub.s32 %v208_v46, %v210_v47  ;;  %s2465_s28 = sshll.u32 %s2825_s27, 4  ;;  %s2466_s28 = int_to_ptr.vmem [resolvable:$true] %s2465_s28 }
  0x24   :  { %2593 = vmatprep.subr.mxu1 %v42_v17  ;;  %v2915_v59 = vsub.s32 %v240_v51, %v210_v47  ;;  %s2785_s29 = scalar_lea.vmem %s2466_s28, 256  ;;  %p2790_p11 = scmp.lt.s32.totalorder %s2466_s28, %s2466_s28 }
  0x25   :  { %2594 = vmatpush3.msra.mxu1 %v42_v17  ;;  %p2786_p10 = scmp.ne.s32.totalorder %s2466_s28, %s2785_s29  ;;  %p2791_p12 = scmp.lt.s32.totalorder %s2785_s29, %s2785_s29 }
  0x27   :  { %p2792_p13 = por %p2791_p12, %p2790_p11 }
  0x29   :  { %p2793_p0 = pnand %p2792_p13, %p2786_p10 }
  0xa7   :  { %v66_v4 = vpop.xlane.xlu0 %65 }
  0xa8   :  { %v71_v5 = vmul.f32 0.03125, %v66_v4 }
  0xaa   :  { %v73_v6 = vsub.f32 %v40_v0, %v71_v5 }
  0xab   :  { %v69_v7 = vpop.xlane.xlu0 %68 }
  0xac   :  { %v72_v8 = vmul.f32 0.03125, %v69_v7  ;;  %v75_v9 = vmul.f32 %v73_v6, %v73_v6 }
  0xae   :  { %v74_v10 = vsub.f32 %v41_v1, %v72_v8  ;;  %v77_v11 = vsel %vm63_vm0, %v75_v9, 0.0 }
  0xaf   :  { %78 = vadd.xlane.f32.xlu1 %v77_v11 }
  0xb0   :  { %v76_v12 = vmul.f32 %v74_v10, %v74_v10 }
  0xb2   :  { %v80_v13 = vsel %vm63_vm0, %v76_v12, 0.0 }
  0xb3   :  { %81 = vadd.xlane.f32.xlu1 %v80_v13 }
 0x138   :  { %v79_v18 = vpop.xlane.xlu1 %78 }
 0x139   :  { %v83_v19 = vmul.f32 0.03125, %v79_v18 }
 0x13b   :  { %v85_v20 = vadd.f32 1e-05, %v83_v19 }
 0x13c   :  { %v82_v21 = vpop.xlane.xlu1 %81 }
 0x13d   :  { %2702 = vrsqrt.f32 %v85_v20  ;;  %v84_v22 = vmul.f32 0.03125, %v82_v21 }
 0x13f   :  { %v86_v23 = vadd.f32 1e-05, %v84_v22 }
 0x141   :  { %2704 = vrsqrt.f32 %v86_v23 }
 0x14a   :  { %v2703_v24 = vpop.eup %2702 }
 0x14b   :  { %v89_v26 = vmul.f32 %v2703_v24, %v73_v6 }
 0x14d   :  { %v95_v28 = vmul.f32 %v2478_v25, %v89_v26 }
 0x14e   :  { %v2705_v29 = vpop.eup %2704 }
 0x14f   :  { %v90_v30 = vmul.f32 %v2705_v29, %v74_v10  ;;  %v101_v31 = vadd.f32 %v2479_v27, %v95_v28 }
 0x151   :  { %v96_v32 = vmul.f32 %v2478_v25, %v90_v30  ;;  %2595 = vmatprep.mubr.msk.f32.mxu1 %vm63_vm0, %v101_v31 }
 0x153   :  { %v102_v33 = vadd.f32 %v2479_v27, %v96_v32 }
 0x155   :  { %2596 = vmatmul.mubr.msk.f32.vlgmr.msra.gmra.mxu1 %vm63_vm0, %v102_v33 }
 0x215   :  { %v2871_v34 = vpop.f32.mrf.mxu1 }
 0x216   :  { %194 = vrot.lane.b32.xlu1 %v2871_v34, %s2815_s0  ;;  %188 = vrot.lane.b32.xlu0 %v2871_v34, %s2816_s1 }
 0x217   :  { %v2875_v35 = vpop.f32.mrf.mxu1 }
 0x21a   :  { %200 = vrot.lane.b32.xlu1 %v2871_v34, %s2817_s21  ;;  %192 = vrot.lane.b32.xlu0 %v2875_v35, %s2815_s0 }
 0x21e   :  { %478 = vrot.lane.b32.xlu0 %v2871_v34, %s2818_s22  ;;  %186 = vrot.lane.b32.xlu1 %v2875_v35, %s2816_s1 }
 0x222   :  { %476 = vrot.lane.b32.xlu0 %v2875_v35, %s2818_s22  ;;  %198 = vrot.lane.b32.xlu1 %v2875_v35, %s2817_s21 }
 0x288   :  { %v2883_v36 = vpop.permute.xlu1 %194  ;;  %v2885_v37 = vpop.permute.xlu0 %188 }
 0x289   :  { %486 = vrot.lane.b32.xlu0 %v2883_v36, %s2818_s22  ;;  %482 = vrot.lane.b32.xlu1 %v2885_v37, %s2818_s22  ;;  %v272_v31 = vcombine.low %v2871_v34, %v2883_v36  ;;  %v273_v40 = vcombine.high %v2871_v34, %v2883_v36 }
 0x28b   :  { %v280_v45 = vrot.slane %v272_v31, %v2904_v52  ;;  %v287_v51 = vrot.slane %v273_v40, %v2904_v52 }
 0x28c   :  { %v2889_v38 = vpop.permute.xlu1 %200  ;;  %v2891_v39 = vpop.permute.xlu0 %192 }
 0x28d   :  { %484 = vrot.lane.b32.xlu0 %v2891_v39, %s2818_s22  ;;  %490 = vrot.lane.b32.xlu1 %v2889_v38, %s2818_s22  ;;  %v204_v48 = vcombine.low %v2875_v35, %v2891_v39  ;;  %v205_v49 = vcombine.high %v2875_v35, %v2891_v39  ;;  %v288_v29 = vcombine.low %v2885_v37, %v2889_v38 }
 0x28e   :  { %v289_v32 = vcombine.high %v2885_v37, %v2889_v38 }
 0x28f   :  { %v212_v55 = vrot.slane %v204_v48, %v2904_v52  ;;  %v219_v56 = vrot.slane %v205_v49, %v2904_v52  ;;  %v296_v41 = vrot.slane %v288_v29, %v2904_v52 }
 0x290   :  { %v2895_v43 = vpop.permute.xlu1 %186  ;;  %v479_v27 = vpop.permute.xlu0 %478  ;;  %v303_v46 = vrot.slane %v289_v32, %v2904_v52 }
 0x291   :  { %480 = vrot.lane.b32.xlu1 %v2895_v43, %s2818_s22 }
 0x294   :  { %v2902_v50 = vpop.permute.xlu1 %198  ;;  %v477_v28 = vpop.permute.xlu0 %476 }
 0x295   :  { %v220_v53 = vcombine.low %v2895_v43, %v2902_v50  ;;  %v221_v54 = vcombine.high %v2895_v43, %v2902_v50  ;;  %488 = vrot.lane.b32.xlu1 %v2902_v50, %s2818_s22 }
 0x297   :  { %v228_v57 = vrot.slane %v220_v53, %v2904_v52  ;;  %v235_v58 = vrot.slane %v221_v54, %v2904_v52  ;;  %v304_v53 = vcombine.low %v280_v45, %v296_v41  ;;  %v305_v54 = vcombine.high %v280_v45, %v296_v41 }
 0x299   :  { %v236_v60 = vcombine.low %v212_v55, %v228_v57  ;;  %v237_v61 = vcombine.high %v212_v55, %v228_v57  ;;  %v252_v62 = vcombine.low %v219_v56, %v235_v58  ;;  %v253_v63 = vcombine.high %v219_v56, %v235_v58 }
 0x29b   :  { %v244_v0 = vrot.slane %v236_v60, %v2915_v59  ;;  %v251_v1 = vrot.slane %v237_v61, %v2915_v59  ;;  %v260_v2 = vrot.slane %v252_v62, %v2915_v59  ;;  %v267_v3 = vrot.slane %v253_v63, %v2915_v59 }
 0x29c   :  { %v320_v60 = vcombine.low %v287_v51, %v303_v46  ;;  %v321_v61 = vcombine.high %v287_v51, %v303_v46 }
 0x29d   :  { %v340_v4 = vcombine.low %v244_v0, %v251_v1  ;;  %v2482_v5 = vcombine.high %v244_v0, %v251_v1  ;;  %v356_v6 = vcombine.low %v260_v2, %v267_v3  ;;  %v2483_v7 = vcombine.high %v260_v2, %v267_v3 }
 0x29f   :  { %v347_v8 = vrot.slane %v340_v4, %v2904_v52  ;;  %v355_v9 = vrot.slane %v2482_v5, %v2904_v52  ;;  %v363_v10 = vrot.slane %v356_v6, %v2904_v52  ;;  %v371_v11 = vrot.slane %v2483_v7, %v2904_v52 }
 0x2a0   :  { %v312_v4 = vrot.slane %v304_v53, %v2915_v59  ;;  %v319_v5 = vrot.slane %v305_v54, %v2915_v59 }
 0x2a1   :  { %v372_v12 = vcombine.low %v347_v8, %v355_v9  ;;  %v388_v13 = vcombine.low %v363_v10, %v371_v11  ;;  %v373_v17 = vcombine.high %v347_v8, %v355_v9  ;;  %v389_v18 = vcombine.high %v363_v10, %v371_v11 }
 0x2a2   :  { %v328_v10 = vrot.slane %v320_v60, %v2915_v59  ;;  %v335_v11 = vrot.slane %v321_v61, %v2915_v59 }
 0x2a3   :  { %v380_v19 = vrot.slane %v372_v12, %v2915_v59  ;;  %v396_v20 = vrot.slane %v388_v13, %v2915_v59  ;;  %v2928_v21 = vrot.slane %v373_v17, %v2915_v59  ;;  %v2931_v22 = vrot.slane %v389_v18, %v2915_v59 }
 0x2a4   :  { %v424_v45 = vcombine.low %v328_v10, %v335_v11  ;;  %v2485_v46 = vcombine.high %v328_v10, %v335_v11 }
 0x2a5   :  { %v404_v23 = vcombine.low %v380_v19, %v396_v20  ;;  %v405_v24 = vcombine.high %v380_v19, %v396_v20  ;;  %v406_v25 = vcombine.low %v2928_v21, %v2931_v22  ;;  %v407_v26 = vcombine.high %v2928_v21, %v2931_v22 }
 0x2a7   :  { %2602 = vmatprep.mubr.msk.f32.mxu1 %vm1068_vm1, %v404_v23  ;;  %2609 = vmatprep.mubr.msk.f32.mxu0 %vm1068_vm1, %v405_v24  ;;  %v408_v24 = vcombine.low %v312_v4, %v319_v5 }
 0x2fb   :  { %v483_v30 = vpop.permute.xlu1 %482  ;;  %v487_v33 = vpop.permute.xlu0 %486 }
 0x2fc   :  { %v568_v42 = vcombine.low %v479_v27, %v487_v33  ;;  %v569_v44 = vcombine.high %v479_v27, %v487_v33  ;;  %v2484_v27 = vcombine.high %v312_v4, %v319_v5 }
 0x2fe   :  { %v576_v55 = vrot.slane %v568_v42, %v2904_v52  ;;  %v583_v56 = vrot.slane %v569_v44, %v2904_v52 }
 0x2ff   :  { %v491_v47 = vpop.permute.xlu1 %490  ;;  %v485_v63 = vpop.permute.xlu0 %484 }
 0x300   :  { %v584_v48 = vcombine.low %v483_v30, %v491_v47  ;;  %v585_v49 = vcombine.high %v483_v30, %v491_v47  ;;  %v500_v12 = vcombine.low %v477_v28, %v485_v63  ;;  %v501_v13 = vcombine.high %v477_v28, %v485_v63 }
 0x302   :  { %v592_v57 = vrot.slane %v584_v48, %v2904_v52  ;;  %v599_v58 = vrot.slane %v585_v49, %v2904_v52  ;;  %v508_v41 = vrot.slane %v500_v12, %v2904_v52  ;;  %v515_v28 = vrot.slane %v501_v13, %v2904_v52 }
 0x303   :  { %v481_v62 = vpop.permute.xlu1 %480 }
 0x304   :  { %v600_v0 = vcombine.low %v576_v55, %v592_v57  ;;  %v601_v1 = vcombine.high %v576_v55, %v592_v57  ;;  %v616_v2 = vcombine.low %v583_v56, %v599_v58  ;;  %v617_v3 = vcombine.high %v583_v56, %v599_v58 }
 0x305   :  { %v2972_v55 = vrot.slane %v408_v24, %v2904_v52  ;;  %v423_v56 = vrot.slane %v2484_v27, %v2904_v52 }
 0x306   :  { %v608_v6 = vrot.slane %v600_v0, %v2915_v59  ;;  %v615_v7 = vrot.slane %v601_v1, %v2915_v59  ;;  %v624_v8 = vrot.slane %v616_v2, %v2915_v59  ;;  %v631_v9 = vrot.slane %v617_v3, %v2915_v59 }
 0x307   :  { %v489_v17 = vpop.permute.xlu1 %488  ;;  %v431_v0 = vrot.slane %v424_v45, %v2904_v52  ;;  %v439_v1 = vrot.slane %v2485_v46, %v2904_v52  ;;  %v441_v46 = vcombine.high %v2972_v55, %v423_v56 }
 0x308   :  { %v704_v18 = vcombine.low %v608_v6, %v615_v7  ;;  %v2488_v19 = vcombine.high %v608_v6, %v615_v7  ;;  %v720_v20 = vcombine.low %v624_v8, %v631_v9  ;;  %v2489_v23 = vcombine.high %v624_v8, %v631_v9 }
 0x309   :  { %v516_v29 = vcombine.low %v481_v62, %v489_v17  ;;  %v517_v30 = vcombine.high %v481_v62, %v489_v17 }
 0x30a   :  { %v711_v31 = vrot.slane %v704_v18, %v2904_v52  ;;  %v719_v32 = vrot.slane %v2488_v19, %v2904_v52  ;;  %v727_v33 = vrot.slane %v720_v20, %v2904_v52  ;;  %v735_v40 = vrot.slane %v2489_v23, %v2904_v52 }
 0x30b   :  { %v524_v42 = vrot.slane %v516_v29, %v2904_v52  ;;  %v531_v44 = vrot.slane %v517_v30, %v2904_v52  ;;  %v440_v19 = vcombine.low %v2972_v55, %v423_v56  ;;  %v456_v20 = vcombine.low %v431_v0, %v439_v1 }
 0x30c   :  { %v736_v47 = vcombine.low %v711_v31, %v719_v32  ;;  %v752_v48 = vcombine.low %v727_v33, %v735_v40  ;;  %v737_v8 = vcombine.high %v711_v31, %v719_v32  ;;  %v753_v9 = vcombine.high %v727_v33, %v735_v40 }
 0x30d   :  { %v532_v49 = vcombine.low %v508_v41, %v524_v42  ;;  %v533_v51 = vcombine.high %v508_v41, %v524_v42  ;;  %v548_v53 = vcombine.low %v515_v28, %v531_v44  ;;  %v549_v54 = vcombine.high %v515_v28, %v531_v44 }
 0x30e   :  { %v744_v57 = vrot.slane %v736_v47, %v2915_v59  ;;  %v760_v58 = vrot.slane %v752_v48, %v2915_v59  ;;  %v751_v27 = vrot.slane %v737_v8, %v2915_v59  ;;  %v767_v29 = vrot.slane %v753_v9, %v2915_v59 }
 0x30f   :  { %v540_v60 = vrot.slane %v532_v49, %v2915_v59  ;;  %v547_v61 = vrot.slane %v533_v51, %v2915_v59  ;;  %v556_v62 = vrot.slane %v548_v53, %v2915_v59  ;;  %v563_v63 = vrot.slane %v549_v54, %v2915_v59 }
 0x310   :  { %v768_v2 = vcombine.low %v744_v57, %v760_v58  ;;  %v769_v3 = vcombine.high %v744_v57, %v760_v58  ;;  %v448_v40 = vrot.slane %v440_v19, %v2915_v59  ;;  %v464_v41 = vrot.slane %v456_v20, %v2915_v59 }
 0x311   :  { %v636_v4 = vcombine.low %v540_v60, %v547_v61  ;;  %v2486_v5 = vcombine.high %v540_v60, %v547_v61  ;;  %v652_v6 = vcombine.low %v556_v62, %v563_v63  ;;  %v2487_v7 = vcombine.high %v556_v62, %v563_v63  ;;  %v61_v62 = vld [vmem:[#allocation5 + $0x68] sm:$0xff] }
 0x312   :  { %2598 = vmatprep.subr.msk.mxu1 %vm1068_vm1, %v768_v2  ;;  %2605 = vmatprep.subr.msk.mxu0 %vm1068_vm1, %v769_v3  ;;  %v770_v28 = vcombine.low %v751_v27, %v767_v29  ;;  %v771_v42 = vcombine.high %v751_v27, %v767_v29  ;;  %v472_v47 = vcombine.low %v448_v40, %v464_v41 }
 0x313   :  { %v643_v10 = vrot.slane %v636_v4, %v2904_v52  ;;  %v651_v11 = vrot.slane %v2486_v5, %v2904_v52  ;;  %v659_v12 = vrot.slane %v652_v6, %v2904_v52  ;;  %v667_v13 = vrot.slane %v2487_v7, %v2904_v52  ;;  %2599 = vmatpush3.xpose.msk.msra.mxu1 %vm1068_vm1, %v768_v2 }
 0x314   :  { %2606 = vmatpush3.xpose.msk.msra.mxu0 %vm1068_vm1, %v769_v3  ;;  %v473_v48 = vcombine.high %v448_v40, %v464_v41  ;;  %v457_v49 = vcombine.high %v431_v0, %v439_v1  ;;  %v455_v54 = vrot.slane %v441_v46, %v2915_v59 }
 0x315   :  { %v668_v17 = vcombine.low %v643_v10, %v651_v11  ;;  %v684_v18 = vcombine.low %v659_v12, %v667_v13  ;;  %v669_v30 = vcombine.high %v643_v10, %v651_v11  ;;  %v685_v31 = vcombine.high %v659_v12, %v667_v13 }
 0x316   :  { %v471_v55 = vrot.slane %v457_v49, %v2915_v59 }
 0x317   :  { %v676_v23 = vrot.slane %v668_v17, %v2915_v59  ;;  %v692_v24 = vrot.slane %v684_v18, %v2915_v59  ;;  %v683_v44 = vrot.slane %v669_v30, %v2915_v59  ;;  %v699_v45 = vrot.slane %v685_v31, %v2915_v59 }
 0x318   :  { %v475_v56 = vcombine.high %v455_v54, %v471_v55 }
 0x319   :  { %v700_v32 = vcombine.low %v676_v23, %v692_v24  ;;  %v701_v33 = vcombine.high %v676_v23, %v692_v24  ;;  %v702_v51 = vcombine.low %v683_v44, %v699_v45  ;;  %v703_v53 = vcombine.high %v683_v44, %v699_v45 }
 0x31b   :  { %2600 = vmatprep.subr.msk.mxu1 %vm1068_vm1, %v700_v32  ;;  %2607 = vmatprep.subr.msk.mxu0 %vm1068_vm1, %v701_v33 }
 0x31c   :  { %2601 = vmatpush3.xpose.msk.msra.mxu1 %vm1068_vm1, %v700_v32  ;;  %2608 = vmatpush3.xpose.msk.msra.mxu0 %vm1068_vm1, %v701_v33 }
 0x31d   :  { %2612 = vmatprep.subr.msk.mxu1 %vm1068_vm1, %v770_v28  ;;  %2619 = vmatprep.subr.msk.mxu0 %vm1068_vm1, %v771_v42 }
 0x31f   :  { %2603 = vmatmul.mubr.msk.f32.vlgmr.msra.gmra.mxu1 %vm1068_vm1, %v472_v47  ;;  %2610 = vmatmul.mubr.msk.f32.vlgmr.msra.gmra.mxu0 %vm1068_vm1, %v473_v48 }
 0x320   :  { %2613 = vmatpush3.xpose.msk.msra.mxu1 %vm1068_vm1, %v770_v28  ;;  %2616 = vmatprep.mubr.msk.f32.mxu1 %vm1068_vm1, %v406_v25  ;;  %v474_v25 = vcombine.low %v455_v54, %v471_v55 }
 0x321   :  { %2620 = vmatpush3.xpose.msk.msra.mxu0 %vm1068_vm1, %v771_v42  ;;  %2623 = vmatprep.mubr.msk.f32.mxu0 %vm1068_vm1, %v407_v26  ;;  %v62_v26 = vld [vmem:[#allocation5 + $0x70] sm:$0xff] }
 0x322   :  { %2614 = vmatprep.subr.msk.mxu1 %vm1068_vm1, %v702_v51  ;;  %2621 = vmatprep.subr.msk.mxu0 %vm1068_vm1, %v703_v53 }
 0x324   :  { %2615 = vmatpush3.xpose.msk.msra.mxu1 %vm1068_vm1, %v702_v51 }
 0x325   :  { %2622 = vmatpush3.xpose.msk.msra.mxu0 %vm1068_vm1, %v703_v53 }
 0x327   :  { %2617 = vmatmul.mubr.msk.f32.vlgmr.msra.gmra.mxu1 %vm1068_vm1, %v474_v25 }
 0x328   :  { %2624 = vmatmul.mubr.msk.f32.vlgmr.msra.gmra.mxu0 %vm1068_vm1, %v475_v56 }
 0x3df   :  { %v2604_v21 = vpop.f32.mrf.mxu1  ;;  %v2611_v22 = vpop.f32.mrf.mxu0 }
 0x3e0   :  { %v1418_v57 = vmul.f32 0.17677669, %v2604_v21  ;;  %v1420_v58 = vmul.f32 0.17677669, %v2611_v22 }
 0x3e1   :  { %v1147_v60 = vpop.f32.mrf.mxu1  ;;  %v1234_v61 = vpop.f32.mrf.mxu0 }
 0x3e2   :  { %v1417_v63 = vmul.f32 0.17677669, %v1147_v60  ;;  %v1428_v0 = vadd.f32 %v1420_v58, %v62_v26  ;;  %v1426_v1 = vadd.f32 %v1418_v57, %v62_v26  ;;  %v1419_v2 = vmul.f32 0.17677669, %v1234_v61 }
 0x3e4   :  { %v1443_v3 = vsel %vm1433_vm2, %v1428_v0, -inf  ;;  %v1437_v4 = vsel %vm1433_vm2, %v1426_v1, -inf  ;;  %v1425_v5 = vadd.f32 %v1417_v63, %v61_v62  ;;  %v1427_v9 = vadd.f32 %v1419_v2, %v61_v62 }
 0x3e5   :  { %1444 = vmax.xlane.f32.xlu0 %v1443_v3  ;;  %1438 = vmax.xlane.f32.xlu1 %v1437_v4 }
 0x3e6   :  { %v1434_v8 = vsel %vm1433_vm2, %v1425_v5, -inf  ;;  %v1440_v19 = vsel %vm1433_vm2, %v1427_v9, -inf }
 0x3e7   :  { %v2618_v6 = vpop.f32.mrf.mxu1 }
 0x3e8   :  { %v2625_v7 = vpop.f32.mrf.mxu0  ;;  %v1422_v18 = vmul.f32 0.17677669, %v2618_v6 }
 0x3e9   :  { %1435 = vmax.xlane.f32.xlu0 %v1434_v8  ;;  %v1321_v10 = vpop.f32.mrf.mxu1  ;;  %v1424_v13 = vmul.f32 0.17677669, %v2625_v7 }
 0x3ea   :  { %v1408_v11 = vpop.f32.mrf.mxu0  ;;  %v1421_v12 = vmul.f32 0.17677669, %v1321_v10  ;;  %v1430_v30 = vadd.f32 %v1422_v18, %v62_v26 }
 0x3eb   :  { %v1423_v17 = vmul.f32 0.17677669, %v1408_v11  ;;  %v1432_v27 = vadd.f32 %v1424_v13, %v62_v26 }
 0x3ec   :  { %v1429_v20 = vadd.f32 %v1421_v12, %v61_v62  ;;  %v1449_v32 = vsel %vm1433_vm2, %v1430_v30, -inf }
 0x3ed   :  { %1441 = vmax.xlane.f32.xlu0 %v1440_v19  ;;  %v1431_v23 = vadd.f32 %v1423_v17, %v61_v62  ;;  %v1455_v31 = vsel %vm1433_vm2, %v1432_v27, -inf }
 0x3ee   :  { %v1446_v29 = vsel %vm1433_vm2, %v1429_v20, -inf }
 0x3ef   :  { %v1452_v24 = vsel %vm1433_vm2, %v1431_v23, -inf }
 0x3f0   :  { %1453 = vmax.xlane.f32.xlu1 %v1452_v24 }
 0x3f1   :  { %1447 = vmax.xlane.f32.xlu0 %v1446_v29 }
 0x3f4   :  { %1456 = vmax.xlane.f32.xlu1 %v1455_v31 }
 0x3f5   :  { %1450 = vmax.xlane.f32.xlu0 %v1449_v32 }
 0x405   :  { %778 = vrot.lane.b32.xlu1 %v2885_v37, %s2821_s23 }
 0x409   :  { %782 = vrot.lane.b32.xlu1 %v2883_v36, %s2821_s23 }
 0x40b   :  { %774 = vrot.lane.b32.xlu0 %v2871_v34, %s2821_s23 }
 0x40d   :  { %786 = vrot.lane.b32.xlu1 %v2889_v38, %s2821_s23 }
 0x40f   :  { %772 = vrot.lane.b32.xlu0 %v2875_v35, %s2821_s23 }
 0x411   :  { %776 = vrot.lane.b32.xlu1 %v2895_v43, %s2821_s23 }
 0x413   :  { %780 = vrot.lane.b32.xlu0 %v2891_v39, %s2821_s23 }
 0x415   :  { %784 = vrot.lane.b32.xlu1 %v2902_v50, %s2821_s23 }
 0x46e   :  { %v1445_v33 = vpop.xlane.xlu0 %1444  ;;  %v1439_v40 = vpop.xlane.xlu1 %1438 }
 0x46f   :  { %v1461_v41 = vsub.f32 %v1428_v0, %v1445_v33  ;;  %v1459_v28 = vsub.f32 %v1426_v1, %v1439_v40 }
 0x471   :  { %v1468_v42 = vmul.f32 1.442695, %v1459_v28  ;;  %v1472_v37 = vmul.f32 1.442695, %v1461_v41 }
 0x472   :  { %v1436_v44 = vpop.xlane.xlu0 %1435 }
 0x473   :  { %v1458_v36 = vsub.f32 %v1425_v5, %v1436_v44  ;;  %2706 = vpow2.f32 %v1468_v42 }
 0x474   :  { %2708 = vpow2.f32 %v1472_v37 }
 0x475   :  { %v1466_v34 = vmul.f32 1.442695, %v1458_v36 }
 0x476   :  { %v1442_v38 = vpop.xlane.xlu0 %1441 }
 0x477   :  { %2710 = vpow2.f32 %v1466_v34  ;;  %v1460_v35 = vsub.f32 %v1427_v9, %v1442_v38 }
 0x479   :  { %v1470_v45 = vmul.f32 1.442695, %v1460_v35  ;;  %v1454_v43 = vpop.xlane.xlu1 %1453 }
 0x47a   :  { %v1464_v46 = vsub.f32 %v1431_v23, %v1454_v43  ;;  %v1448_v39 = vpop.xlane.xlu0 %1447 }
 0x47b   :  { %2712 = vpow2.f32 %v1470_v45  ;;  %v1462_v50 = vsub.f32 %v1429_v20, %v1448_v39 }
 0x47c   :  { %v1478_v47 = vmul.f32 1.442695, %v1464_v46 }
 0x47d   :  { %v1474_v48 = vmul.f32 1.442695, %v1462_v50  ;;  %v1457_v49 = vpop.xlane.xlu1 %1456 }
 0x47e   :  { %2714 = vpow2.f32 %v1478_v47  ;;  %v1465_v51 = vsub.f32 %v1432_v27, %v1457_v49  ;;  %v1451_v53 = vpop.xlane.xlu0 %1450 }
 0x47f   :  { %2716 = vpow2.f32 %v1474_v48  ;;  %v1463_v54 = vsub.f32 %v1430_v30, %v1451_v53 }
 0x480   :  { %v1480_v55 = vmul.f32 1.442695, %v1465_v51  ;;  %v3043_v25 = vpop.eup %2706 }
 0x481   :  { %v1476_v56 = vmul.f32 1.442695, %v1463_v54  ;;  %v779_v21 = vpop.permute.xlu1 %778  ;;  %v1485_v22 = vsel %vm1433_vm2, %v3043_v25, 0.0  ;;  %v3047_v57 = vpop.eup %2708 }
 0x482   :  { %2718 = vpow2.f32 %v1480_v55  ;;  %v775_v26 = vpop.permute.xlu0 %774  ;;  %1486 = vadd.xlane.f32.xlu1 %v1485_v22  ;;  %v1491_v62 = vsel %vm1433_vm2, %v3047_v57, 0.0 }
 0x483   :  { %2720 = vpow2.f32 %v1476_v56 }
 0x484   :  { %v3049_v58 = vpop.eup %2710 }
 0x485   :  { %v783_v60 = vpop.permute.xlu1 %782  ;;  %v1482_v61 = vsel %vm1433_vm2, %v3049_v58, 0.0 }
 0x486   :  { %1483 = vadd.xlane.f32.xlu0 %v1482_v61  ;;  %v864_v63 = vcombine.low %v775_v26, %v783_v60  ;;  %1492 = vadd.xlane.f32.xlu1 %v1491_v62  ;;  %v865_v1 = vcombine.high %v775_v26, %v783_v60  ;;  %v773_v2 = vpop.permute.xlu0 %772 }
 0x488   :  { %v3055_v0 = vpop.eup %2712  ;;  %v872_v8 = vrot.slane %v864_v63, %v2904_v52  ;;  %v879_v10 = vrot.slane %v865_v1, %v2904_v52 }
 0x489   :  { %v787_v3 = vpop.permute.xlu1 %786  ;;  %v1488_v4 = vsel %vm1433_vm2, %v3055_v0, 0.0 }
 0x48a   :  { %v880_v5 = vcombine.low %v779_v21, %v787_v3  ;;  %v881_v6 = vcombine.high %v779_v21, %v787_v3  ;;  %1489 = vadd.xlane.f32.xlu0 %v1488_v4  ;;  %v781_v27 = vpop.permute.xlu0 %780 }
 0x48b   :  { %v3059_v7 = vpop.eup %2714  ;;  %v796_v41 = vcombine.low %v773_v2, %v781_v27  ;;  %v797_v28 = vcombine.high %v773_v2, %v781_v27 }
 0x48c   :  { %v3062_v9 = vpop.eup %2716  ;;  %v888_v11 = vrot.slane %v880_v5, %v2904_v52  ;;  %v895_v12 = vrot.slane %v881_v6, %v2904_v52  ;;  %v1500_v13 = vsel %vm1433_vm2, %v3059_v7, 0.0 }
 0x48d   :  { %1501 = vadd.xlane.f32.xlu1 %v1500_v13  ;;  %v777_v17 = vpop.permute.xlu1 %776  ;;  %v1494_v18 = vsel %vm1433_vm2, %v3062_v9, 0.0  ;;  %v804_v48 = vrot.slane %v796_v41, %v2904_v52  ;;  %v811_v49 = vrot.slane %v797_v28, %v2904_v52 }
 0x48e   :  { %v896_v19 = vcombine.low %v872_v8, %v888_v11  ;;  %v897_v20 = vcombine.high %v872_v8, %v888_v11  ;;  %v912_v23 = vcombine.low %v879_v10, %v895_v12  ;;  %v913_v24 = vcombine.high %v879_v10, %v895_v12  ;;  %1495 = vadd.xlane.f32.xlu0 %v1494_v18 }
 0x48f   :  { %v3071_v29 = vpop.eup %2718 }
 0x490   :  { %v3073_v30 = vpop.eup %2720  ;;  %v904_v31 = vrot.slane %v896_v19, %v2915_v59  ;;  %v911_v32 = vrot.slane %v897_v20, %v2915_v59  ;;  %v920_v33 = vrot.slane %v912_v23, %v2915_v59  ;;  %v927_v40 = vrot.slane %v913_v24, %v2915_v59 }
 0x491   :  { %v1503_v42 = vsel %vm1433_vm2, %v3071_v29, 0.0  ;;  %v785_v37 = vpop.permute.xlu1 %784  ;;  %v1497_v44 = vsel %vm1433_vm2, %v3073_v30, 0.0 }
 0x492   :  { %v1000_v36 = vcombine.low %v904_v31, %v911_v32  ;;  %v2492_v34 = vcombine.high %v904_v31, %v911_v32  ;;  %v1016_v38 = vcombine.low %v920_v33, %v927_v40  ;;  %v2493_v35 = vcombine.high %v920_v33, %v927_v40  ;;  %1504 = vadd.xlane.f32.xlu1 %v1503_v42 }
 0x493   :  { %v812_v45 = vcombine.low %v777_v17, %v785_v37  ;;  %v813_v43 = vcombine.high %v777_v17, %v785_v37  ;;  %1498 = vadd.xlane.f32.xlu0 %v1497_v44 }
 0x494   :  { %v1007_v46 = vrot.slane %v1000_v36, %v2904_v52  ;;  %v1015_v39 = vrot.slane %v2492_v34, %v2904_v52  ;;  %v1023_v50 = vrot.slane %v1016_v38, %v2904_v52  ;;  %v1031_v47 = vrot.slane %v2493_v35, %v2904_v52 }
 0x495   :  { %v820_v51 = vrot.slane %v812_v45, %v2904_v52  ;;  %v827_v53 = vrot.slane %v813_v43, %v2904_v52 }
 0x496   :  { %v1032_v54 = vcombine.low %v1007_v46, %v1015_v39  ;;  %v1048_v55 = vcombine.low %v1023_v50, %v1031_v47  ;;  %v1033_v56 = vcombine.high %v1007_v46, %v1015_v39  ;;  %v1049_v21 = vcombine.high %v1023_v50, %v1031_v47 }
 0x497   :  { %v828_v22 = vcombine.low %v804_v48, %v820_v51  ;;  %v829_v26 = vcombine.high %v804_v48, %v820_v51  ;;  %v844_v60 = vcombine.low %v811_v49, %v827_v53  ;;  %v845_v61 = vcombine.high %v811_v49, %v827_v53 }
 0x498   :  { %v1040_v62 = vrot.slane %v1032_v54, %v2915_v59  ;;  %v1056_v63 = vrot.slane %v1048_v55, %v2915_v59  ;;  %v1047_v1 = vrot.slane %v1033_v56, %v2915_v59  ;;  %v1063_v2 = vrot.slane %v1049_v21, %v2915_v59 }
 0x499   :  { %v836_v3 = vrot.slane %v828_v22, %v2915_v59  ;;  %v843_v4 = vrot.slane %v829_v26, %v2915_v59  ;;  %v852_v5 = vrot.slane %v844_v60, %v2915_v59  ;;  %v859_v6 = vrot.slane %v845_v61, %v2915_v59 }
 0x49a   :  { %v1064_v8 = vcombine.low %v1040_v62, %v1056_v63  ;;  %v1066_v10 = vcombine.low %v1047_v1, %v1063_v2  ;;  %v3099_v11 = vcombine.high %v1047_v1, %v1063_v2  ;;  %v1065_v38 = vcombine.high %v1040_v62, %v1056_v63 }
 0x49b   :  { %v932_v12 = vcombine.low %v836_v3, %v843_v4  ;;  %v2490_v13 = vcombine.high %v836_v3, %v843_v4  ;;  %v948_v17 = vcombine.low %v852_v5, %v859_v6  ;;  %v2491_v18 = vcombine.high %v852_v5, %v859_v6 }
 0x49c   :  { %2626 = vmatprep.subr.mxu1 %v1064_v8  ;;  %2640 = vmatprep.subr.mxu0 %v1066_v10 }
 0x49d   :  { %2627 = vmatpush3.msra.mxu1 %v1064_v8  ;;  %2641 = vmatpush3.msra.mxu0 %v1066_v10  ;;  %v939_v19 = vrot.slane %v932_v12, %v2904_v52  ;;  %v947_v20 = vrot.slane %v2490_v13, %v2904_v52  ;;  %v955_v23 = vrot.slane %v948_v17, %v2904_v52 }
 0x49e   :  { %v963_v24 = vrot.slane %v2491_v18, %v2904_v52 }
 0x49f   :  { %v964_v27 = vcombine.low %v939_v19, %v947_v20  ;;  %v965_v31 = vcombine.high %v939_v19, %v947_v20 }
 0x4a0   :  { %v980_v32 = vcombine.low %v955_v23, %v963_v24  ;;  %v981_v33 = vcombine.high %v955_v23, %v963_v24 }
 0x4a1   :  { %v972_v40 = vrot.slane %v964_v27, %v2915_v59  ;;  %v979_v41 = vrot.slane %v965_v31, %v2915_v59 }
 0x4a2   :  { %v988_v28 = vrot.slane %v980_v32, %v2915_v59  ;;  %v995_v42 = vrot.slane %v981_v33, %v2915_v59 }
 0x4a3   :  { %2161 = vrot.lane.b32.xlu1 %v2859_v15, %s2822_s24 }
 0x4a4   :  { %v996_v37 = vcombine.low %v972_v40, %v988_v28  ;;  %v998_v44 = vcombine.low %v979_v41, %v995_v42  ;;  %v997_v36 = vcombine.high %v972_v40, %v988_v28  ;;  %v999_v34 = vcombine.high %v979_v41, %v995_v42 }
 0x4a6   :  { %2628 = vmatprep.subr.mxu1 %v996_v37  ;;  %2642 = vmatprep.subr.mxu0 %v998_v44 }
 0x4a7   :  { %2629 = vmatpush3.msra.mxu1 %v996_v37  ;;  %2643 = vmatpush3.msra.mxu0 %v998_v44 }
 0x4a8   :  { %2633 = vmatprep.subr.mxu1 %v1065_v38  ;;  %2159 = vrot.lane.b32.xlu1 %v2863_v16, %s2822_s24 }
 0x4a9   :  { %2163 = vrot.lane.b32.xlu0 %v2857_v14, %s2822_s24 }
 0x50b   :  { %v1487_v35 = vpop.xlane.xlu1 %1486 }
 0x50c   :  { %2722 = vrcp.f32 %v1487_v35 }
 0x50f   :  { %v1484_v45 = vpop.xlane.xlu0 %1483  ;;  %v1493_v43 = vpop.xlane.xlu1 %1492 }
 0x510   :  { %2724 = vrcp.f32 %v1484_v45 }
 0x511   :  { %2726 = vrcp.f32 %v1493_v43 }
 0x513   :  { %v1490_v46 = vpop.xlane.xlu0 %1489 }
 0x514   :  { %2728 = vrcp.f32 %v1490_v46 }
 0x516   :  { %v1502_v39 = vpop.xlane.xlu1 %1501 }
 0x517   :  { %2730 = vrcp.f32 %v1502_v39  ;;  %v1496_v50 = vpop.xlane.xlu0 %1495 }
 0x518   :  { %2732 = vrcp.f32 %v1496_v50 }
 0x519   :  { %v2723_v48 = vpop.eup %2722 }
 0x51a   :  { %v1515_v54 = vmul.f32 %v2723_v48, %v3043_v25 }
 0x51b   :  { %v1505_v47 = vpop.xlane.xlu1 %1504 }
 0x51c   :  { %2734 = vrcp.f32 %v1505_v47  ;;  %v1499_v49 = vpop.xlane.xlu0 %1498 }
 0x51d   :  { %v2725_v51 = vpop.eup %2724  ;;  %2736 = vrcp.f32 %v1499_v49 }
 0x51e   :  { %v1514_v53 = vmul.f32 %v2725_v51, %v3049_v58  ;;  %v2727_v55 = vpop.eup %2726 }
 0x51f   :  { %v1517_v22 = vmul.f32 %v2727_v55, %v3047_v57 }
 0x520   :  { %2630 = vmatprep.mubr.msk.f32.mxu1 %vm1433_vm2, %v1514_v53  ;;  %v2164_v5 = vpop.permute.xlu0 %2163 }
 0x521   :  { %v2729_v56 = vpop.eup %2728  ;;  %2631 = vmatmul.mubr.msk.f32.vlgmr.msra.gmra.mxu1 %vm1433_vm2, %v1515_v54  ;;  %2654 = vmatprep.subr.mxu0 %v2164_v5 }
 0x522   :  { %2634 = vmatpush3.msra.mxu1 %v1065_v38  ;;  %v1516_v21 = vmul.f32 %v2729_v56, %v3055_v0 }
 0x523   :  { %2635 = vmatprep.subr.mxu1 %v997_v36 }
 0x524   :  { %v2731_v26 = vpop.eup %2730  ;;  %2636 = vmatpush3.msra.mxu1 %v997_v36  ;;  %2637 = vmatprep.mubr.msk.f32.mxu1 %vm1433_vm2, %v1516_v21 }
 0x525   :  { %v2733_v60 = vpop.eup %2732  ;;  %2647 = vmatprep.subr.mxu1 %v3099_v11  ;;  %2638 = vmatmul.mubr.msk.f32.vlgmr.msra.gmra.mxu1 %vm1433_vm2, %v1517_v22  ;;  %v1520_v25 = vmul.f32 %v2731_v26, %v3059_v7 }
 0x526   :  { %2648 = vmatpush3.msra.mxu1 %v3099_v11  ;;  %v1518_v58 = vmul.f32 %v2733_v60, %v3062_v9 }
 0x527   :  { %2649 = vmatprep.subr.mxu1 %v999_v34  ;;  %2651 = vmatprep.mubr.msk.f32.mxu1 %vm1433_vm2, %v1520_v25 }
 0x528   :  { %2650 = vmatpush3.msra.mxu1 %v999_v34  ;;  %2644 = vmatprep.mubr.msk.f32.mxu0 %vm1433_vm2, %v1518_v58 }
 0x529   :  { %v2735_v57 = vpop.eup %2734 }
 0x52a   :  { %v2737_v0 = vpop.eup %2736  ;;  %v1521_v61 = vmul.f32 %v2735_v57, %v3071_v29 }
 0x52b   :  { %v1519_v62 = vmul.f32 %v2737_v0, %v3073_v30  ;;  %v2162_v30 = vpop.permute.xlu1 %2161 }
 0x52c   :  { %2652 = vmatmul.mubr.msk.f32.vlgmr.msra.gmra.mxu1 %vm1433_vm2, %v1521_v61 }
 0x52d   :  { %2645 = vmatmul.mubr.msk.f32.vlgmr.msra.gmra.mxu0 %vm1433_vm2, %v1519_v62 }
 0x52e   :  { %2655 = vmatpush3.msra.mxu0 %v2164_v5 }
 0x52f   :  { %2656 = vmatprep.subr.mxu0 %v2162_v30  ;;  %v2160_v20 = vpop.permute.xlu1 %2159 }
 0x530   :  { %2657 = vmatpush3.msra.mxu0 %v2162_v30 }
 0x531   :  { %2658 = vmatprep.subr.mxu0 %v2160_v20 }
 0x532   :  { %2659 = vmatpush3.msra.mxu0 %v2160_v20 }
 0x5e1   :  { %v2632_v7 = vpop.f32.mrf.mxu1 }
 0x5e3   :  { %v1594_v9 = vpop.f32.mrf.mxu1 }
 0x5e5   :  { %v2639_v63 = vpop.f32.mrf.mxu1 }
 0x5e7   :  { %v1675_v29 = vpop.f32.mrf.mxu1 }
 0x5ec   :  { %v2653_v1 = vpop.f32.mrf.mxu1 }
 0x5ed   :  { %v1930_v2 = vcombine.low %v2639_v63, %v2653_v1  ;;  %v1931_v3 = vcombine.high %v2639_v63, %v2653_v1  ;;  %v2646_v4 = vpop.f32.mrf.mxu0 }
 0x5ee   :  { %v1914_v6 = vcombine.low %v2632_v7, %v2646_v4  ;;  %v1915_v8 = vcombine.high %v2632_v7, %v2646_v4  ;;  %v1837_v10 = vpop.f32.mrf.mxu1 }
 0x5ef   :  { %v1938_v15 = vrot.slane %v1930_v2, %v2904_v52  ;;  %v1945_v14 = vrot.slane %v1931_v3, %v2904_v52  ;;  %v1862_v11 = vcombine.low %v1675_v29, %v1837_v10  ;;  %v1863_v16 = vcombine.high %v1675_v29, %v1837_v10  ;;  %v1756_v12 = vpop.f32.mrf.mxu0 }
 0x5f0   :  { %v1922_v13 = vrot.slane %v1914_v6, %v2904_v52  ;;  %v1929_v17 = vrot.slane %v1915_v8, %v2904_v52  ;;  %v1846_v18 = vcombine.low %v1594_v9, %v1756_v12  ;;  %v1847_v19 = vcombine.high %v1594_v9, %v1756_v12 }
 0x5f1   :  { %v1870_v32 = vrot.slane %v1862_v11, %v2904_v52  ;;  %v1877_v33 = vrot.slane %v1863_v16, %v2904_v52 }
 0x5f2   :  { %v1946_v23 = vcombine.low %v1922_v13, %v1938_v15  ;;  %v1947_v24 = vcombine.high %v1922_v13, %v1938_v15  ;;  %v1962_v27 = vcombine.low %v1929_v17, %v1945_v14  ;;  %v1963_v31 = vcombine.high %v1929_v17, %v1945_v14 }
 0x5f3   :  { %v1854_v40 = vrot.slane %v1846_v18, %v2904_v52  ;;  %v1861_v41 = vrot.slane %v1847_v19, %v2904_v52  ;;  %v2742_v18 = vld [vmem:[#allocation5] sm:$0xff] }
 0x5f4   :  { %v1954_v28 = vrot.slane %v1946_v23, %v2915_v59  ;;  %v1961_v42 = vrot.slane %v1947_v24, %v2915_v59  ;;  %v1970_v37 = vrot.slane %v1962_v27, %v2915_v59  ;;  %v1977_v44 = vrot.slane %v1963_v31, %v2915_v59 }
 0x5f5   :  { %v1878_v36 = vcombine.low %v1854_v40, %v1870_v32  ;;  %v1879_v34 = vcombine.high %v1854_v40, %v1870_v32  ;;  %v1894_v38 = vcombine.low %v1861_v41, %v1877_v33  ;;  %v1895_v35 = vcombine.high %v1861_v41, %v1877_v33 }
 0x5f6   :  { %v2050_v45 = vcombine.low %v1954_v28, %v1961_v42  ;;  %v2520_v43 = vcombine.high %v1954_v28, %v1961_v42  ;;  %v2066_v46 = vcombine.low %v1970_v37, %v1977_v44  ;;  %v2521_v39 = vcombine.high %v1970_v37, %v1977_v44  ;;  %v2522_v37 = vld [vmem:[#allocation5 + $0x63] ss:$0 sm:$0xff] }
 0x5f7   :  { %v1886_v50 = vrot.slane %v1878_v36, %v2915_v59  ;;  %v1893_v47 = vrot.slane %v1879_v34, %v2915_v59  ;;  %v1902_v48 = vrot.slane %v1894_v38, %v2915_v59  ;;  %v1909_v49 = vrot.slane %v1895_v35, %v2915_v59  ;;  %v2743_v38 = vld [vmem:[#allocation2 + $0x8] sm:$0xff] }
 0x5f8   :  { %v2057_v51 = vrot.slane %v2050_v45, %v2904_v52  ;;  %v2065_v53 = vrot.slane %v2520_v43, %v2904_v52  ;;  %v2073_v54 = vrot.slane %v2066_v46, %v2904_v52  ;;  %v2081_v55 = vrot.slane %v2521_v39, %v2904_v52  ;;  %v2744_v43 = vld [vmem:[#allocation2] sm:$0xff] }
 0x5f9   :  { %v1982_v56 = vcombine.low %v1886_v50, %v1893_v47  ;;  %v2518_v21 = vcombine.high %v1886_v50, %v1893_v47  ;;  %v1998_v22 = vcombine.low %v1902_v48, %v1909_v49  ;;  %v2519_v26 = vcombine.high %v1902_v48, %v1909_v49 }
 0x5fa   :  { %v2082_v60 = vcombine.low %v2057_v51, %v2065_v53  ;;  %v2098_v25 = vcombine.low %v2073_v54, %v2081_v55  ;;  %v2083_v58 = vcombine.high %v2057_v51, %v2065_v53  ;;  %v2099_v57 = vcombine.high %v2073_v54, %v2081_v55 }
 0x5fb   :  { %v1989_v0 = vrot.slane %v1982_v56, %v2904_v52  ;;  %v1997_v61 = vrot.slane %v2518_v21, %v2904_v52  ;;  %v2005_v62 = vrot.slane %v1998_v22, %v2904_v52  ;;  %v2013_v7 = vrot.slane %v2519_v26, %v2904_v52  ;;  %v49_v26 = vld [vmem:[#allocation5 + $0x38] sm:$0xff] }
 0x5fc   :  { %v2090_v9 = vrot.slane %v2082_v60, %v2915_v59  ;;  %v2106_v63 = vrot.slane %v2098_v25, %v2915_v59  ;;  %v2097_v5 = vrot.slane %v2083_v58, %v2915_v59  ;;  %v2113_v6 = vrot.slane %v2099_v57, %v2915_v59  ;;  %v48_v60 = vld [vmem:[#allocation5 + $0x30] sm:$0xff]  ;;  %2665 = vmatprep.subr.mxu1 %v49_v26  ;;  %v47_v25 = vld [vmem:[#allocation5 + $0x28] sm:$0xff]  ;;  %v46_v58 = vld [vmem:[#allocation5 + $0x20] sm:$0xff] }
 0x5fd   :  { %v2015_v29 = vcombine.high %v1989_v0, %v1997_v61  ;;  %v2031_v1 = vcombine.high %v2005_v62, %v2013_v7  ;;  %v2014_v30 = vcombine.low %v1989_v0, %v1997_v61  ;;  %v2030_v2 = vcombine.low %v2005_v62, %v2013_v7  ;;  %2666 = vmatpush3.msra.mxu1 %v49_v26  ;;  %v53_v57 = vld [vmem:[#allocation5 + $0x58] sm:$0xff]  ;;  %v52_v0 = vld [vmem:[#allocation5 + $0x50] sm:$0xff] }
 0x5fe   :  { %v2115_v3 = vcombine.high %v2090_v9, %v2106_v63  ;;  %v2114_v4 = vcombine.low %v2090_v9, %v2106_v63  ;;  %v2116_v16 = vcombine.low %v2097_v5, %v2113_v6  ;;  %v2117_v17 = vcombine.high %v2097_v5, %v2113_v6  ;;  %2667 = vmatprep.subr.mxu1 %v48_v60 }
 0x5ff   :  { %v2029_v8 = vrot.slane %v2015_v29, %v2915_v59  ;;  %v2045_v10 = vrot.slane %v2031_v1, %v2915_v59  ;;  %v2022_v52 = vrot.slane %v2014_v30, %v2915_v59  ;;  %v2038_v15 = vrot.slane %v2030_v2, %v2915_v59  ;;  %2668 = vmatpush3.msra.mxu1 %v48_v60  ;;  %v2525_v30 = vld [vmem:[#allocation5 + $0x64] ss:$0 sm:$0xff] }
 0x600   :  { %2122 = vrot.lane.b32.xlu0 %v2115_v3, %s2813_s13  ;;  %2669 = vmatprep.subr.mxu1 %v47_v25  ;;  %v2526_v3 = vld [vmem:[#allocation5 + $0x65] ss:$0 sm:$0xff] }
 0x601   :  { %v2048_v14 = vcombine.low %v2029_v8, %v2045_v10  ;;  %v2046_v11 = vcombine.low %v2022_v52, %v2038_v15  ;;  %v2049_v12 = vcombine.high %v2029_v8, %v2045_v10  ;;  %v2047_v13 = vcombine.high %v2022_v52, %v2038_v15  ;;  %2670 = vmatpush3.msra.mxu1 %v47_v25  ;;  %v51_v15 = vld [vmem:[#allocation5 + $0x48] sm:$0xff] }
 0x602   :  { %2671 = vmatprep.subr.mxu1 %v46_v58 }
 0x603   :  { %2128 = vrot.lane.b32.xlu1 %v2048_v14, %s2823_s25  ;;  %2672 = vmatpush3.msra.mxu1 %v46_v58  ;;  %v50_v14 = vld [vmem:[#allocation5 + $0x40] sm:$0xff] }
 0x604   :  { %2130 = vrot.lane.b32.xlu0 %v2116_v16, %s2823_s25 }
 0x607   :  { %2136 = vrot.lane.b32.xlu1 %v2049_v12, %s2824_s26 }
 0x608   :  { %2120 = vrot.lane.b32.xlu0 %v2047_v13, %s2813_s13 }
 0x60b   :  { %2138 = vrot.lane.b32.xlu1 %v2117_v17, %s2824_s26 }
 0x60c   :  { %2157 = vrot.lane.b32.xlu0 %v2742_v18, %s2822_s24 }
 0x672   :  { %v2123_v59 = vpop.permute.xlu0 %2122 }
 0x673   :  { %v2143_v40 = vsel %vm1068_vm1, %v2114_v4, %v2123_v59 }
 0x675   :  { %v2129_v19 = vpop.permute.xlu1 %2128 }
 0x676   :  { %v2131_v20 = vpop.permute.xlu0 %2130 }
 0x677   :  { %v2145_v28 = vsel %vm1433_vm2, %v2143_v40, %v2131_v20 }
 0x679   :  { %v2137_v23 = vpop.permute.xlu1 %2136 }
 0x67a   :  { %v2121_v24 = vpop.permute.xlu0 %2120 }
 0x67b   :  { %v2142_v27 = vsel %vm1068_vm1, %v2046_v11, %v2121_v24  ;;  %v2527_v11 = vld [vmem:[#allocation5 + $0x60] ss:$0 sm:$0xff] }
 0x67c   :  { %v2144_v31 = vsel %vm1433_vm2, %v2142_v27, %v2129_v19  ;;  %v2530_v19 = vld [vmem:[#allocation5 + $0x66] ss:$0 sm:$0xff] }
 0x67d   :  { %v2139_v32 = vpop.permute.xlu1 %2138  ;;  %v2147_v33 = vsel %vm2146_vm3, %v2144_v31, %v2137_v23 }
 0x67e   :  { %2662 = vmatprep.mubr.msk.f32.mxu0 %vm63_vm0, %v2147_v33  ;;  %v2158_v41 = vpop.permute.xlu0 %2157  ;;  %v2148_v42 = vsel %vm2146_vm3, %v2145_v28, %v2139_v32 }
 0x67f   :  { %2660 = vmatprep.subr.mxu0 %v2158_v41 }
 0x680   :  { %2661 = vmatpush3.msra.mxu0 %v2158_v41 }
 0x681   :  { %2663 = vmatmul.mubr.msk.f32.vlgmr.msra.gmra.mxu0 %vm63_vm0, %v2148_v42  ;;  %2676 = vmatprep.subr.mxu0 %v53_v57 }
 0x682   :  { %2677 = vmatpush3.xpose.msra.mxu0 %v53_v57 }
 0x683   :  { %2678 = vmatprep.subr.mxu0 %v52_v0 }
 0x686   :  { %2679 = vmatpush3.xpose.msra.mxu0 %v52_v0 }
 0x687   :  { %2680 = vmatprep.subr.mxu0 %v51_v15 }
 0x68a   :  { %2681 = vmatpush3.xpose.msra.mxu0 %v51_v15 }
 0x68b   :  { %2682 = vmatprep.subr.mxu0 %v50_v14 }
 0x68e   :  { %2683 = vmatpush3.xpose.msra.mxu0 %v50_v14 }
 0x741   :  { %v2664_v44 = vpop.f32.mrf.mxu0 }
 0x742   :  { %v2247_v36 = vadd.f32 %v2664_v44, %v2522_v37 }
 0x743   :  { %v2241_v34 = vpop.f32.mrf.mxu0 }
 0x744   :  { %v3174_v35 = vadd.f32 %v2743_v38, %v2247_v36  ;;  %v2242_v45 = vadd.f32 %v2522_v37, %v2241_v34 }
 0x746   :  { %v3176_v46 = vadd.f32 %v2744_v43, %v2242_v45  ;;  %v2255_v39 = vsel %vm63_vm0, %v3174_v35, 0.0 }
 0x747   :  { %2256 = vadd.xlane.f32.xlu1 %v2255_v39 }
 0x748   :  { %v2252_v50 = vsel %vm63_vm0, %v3176_v46, 0.0 }
 0x749   :  { %2253 = vadd.xlane.f32.xlu0 %v2252_v50 }
 0x7d0   :  { %v2257_v47 = vpop.xlane.xlu1 %2256 }
 0x7d1   :  { %v2259_v48 = vmul.f32 0.03125, %v2257_v47 }
 0x7d2   :  { %v2254_v49 = vpop.xlane.xlu0 %2253 }
 0x7d3   :  { %v2258_v51 = vmul.f32 0.03125, %v2254_v49  ;;  %v2261_v53 = vsub.f32 %v3174_v35, %v2259_v48 }
 0x7d5   :  { %v2260_v54 = vsub.f32 %v3176_v46, %v2258_v51  ;;  %v2263_v21 = vmul.f32 %v2261_v53, %v2261_v53 }
 0x7d7   :  { %v2262_v55 = vmul.f32 %v2260_v54, %v2260_v54  ;;  %v2267_v22 = vsel %vm63_vm0, %v2263_v21, 0.0 }
 0x7d9   :  { %v2264_v56 = vsel %vm63_vm0, %v2262_v55, 0.0 }
 0x7da   :  { %2265 = vadd.xlane.f32.xlu0 %v2264_v56 }
 0x7de   :  { %2268 = vadd.xlane.f32.xlu0 %v2267_v22 }
 0x863   :  { %v2266_v61 = vpop.xlane.xlu0 %2265 }
 0x864   :  { %v2270_v62 = vmul.f32 0.03125, %v2266_v61 }
 0x866   :  { %v2272_v7 = vadd.f32 1e-05, %v2270_v62 }
 0x867   :  { %v2269_v9 = vpop.xlane.xlu0 %2268 }
 0x868   :  { %2738 = vrsqrt.f32 %v2272_v7  ;;  %v2271_v63 = vmul.f32 0.03125, %v2269_v9 }
 0x86a   :  { %v2273_v29 = vadd.f32 1e-05, %v2271_v63 }
 0x86c   :  { %2740 = vrsqrt.f32 %v2273_v29 }
 0x875   :  { %v2739_v1 = vpop.eup %2738 }
 0x876   :  { %v2276_v2 = vmul.f32 %v2739_v1, %v2260_v54 }
 0x878   :  { %v2282_v4 = vmul.f32 %v2525_v30, %v2276_v2 }
 0x879   :  { %v2741_v5 = vpop.eup %2740 }
 0x87a   :  { %v2277_v6 = vmul.f32 %v2741_v5, %v2261_v53  ;;  %v2288_v8 = vadd.f32 %v2526_v3, %v2282_v4 }
 0x87c   :  { %v2283_v10 = vmul.f32 %v2525_v30, %v2277_v6  ;;  %2673 = vmatprep.mubr.msk.f32.mxu1 %vm63_vm0, %v2288_v8 }
 0x87e   :  { %v2289_v52 = vadd.f32 %v2526_v3, %v2283_v10 }
 0x880   :  { %2674 = vmatmul.mubr.msk.f32.vlgmr.msra.gmra.mxu1 %vm63_vm0, %v2289_v52 }
 0x940   :  { %v2675_v16 = vpop.f32.mrf.mxu1 }
 0x941   :  { %v2372_v12 = vadd.f32 %v2675_v16, %v2527_v11 }
 0x942   :  { %v2366_v13 = vpop.f32.mrf.mxu1 }
 0x943   :  { %v2367_v17 = vadd.f32 %v2527_v11, %v2366_v13  ;;  %v2376_v59 = vmax.f32 %v2372_v12, 0.0 }
 0x945   :  { %v2375_v18 = vmax.f32 %v2367_v17, 0.0 }
 0x947   :  { %2684 = vmatprep.mubr.f32.mxu0 %v2375_v18 }
 0x948   :  { %2685 = vmatmul.mubr.f32.vlgmr.msra.gmra.mxu0 %v2376_v59 }
 0xa08   :  { %v2686_v20 = vpop.f32.mrf.mxu0 }
 0xa09   :  { %v2453_v23 = vadd.f32 %v2686_v20, %v2530_v19 }
 0xa0a   :  { %v2447_v24 = vpop.f32.mrf.mxu0 }
 0xa0b   :  { %v2457_v27 = vadd.f32 %v2453_v23, %v3174_v35  ;;  %v2448_v31 = vadd.f32 %v2530_v19, %v2447_v24 }
 0xa0d   :  { %2459 = vst.msk [vmem:[#allocation7 + $0x8] sm:$0xff] %vm63_vm0, %v2457_v27  ;;  %v2456_v32 = vadd.f32 %v2448_v31, %v3176_v46 }
 0xa0f   :  { %2458 = vst.msk [vmem:[#allocation7] sm:$0xff] %vm63_vm0, %v2456_v32 }
 0xa10   :  { %2796 = shalt.err (!%p2793_p0)
}
 0xa11   :  { %2471 = dma.vmem_to_hbm [thread:$0]  %s2466_s28, 256, %s3200_s2, [#allocation4], %s2812_s12, %s2812_s12, %s2813_s13  }
 0xa12   :  { %2809 = dma.done.wait [#allocation4], 256  }
 0xa13   :  { %2810 = vsyncadd [#allocation4], 4294967040 }
 0xa14   :  { %2475 = vsyncpa [#allocation3], 1 }
 0xa15   :  { %2476 = vsyncpa [#allocation6], 1 }
 0xa16   :  { %2477 = vsyncpa [#allocation4], 1 }

</bundles_post_ra>
